<compile_context>
chip_gen: v5e
topology: v5e:2x2
jax: 0.10.0
libtpu: 0.0.40
codegen_flags: <defaults>
</compile_context>

<pallas_src>
from functools import partial

import jax
import jax.numpy as jnp
from jax.experimental import pallas as pl
from jax.experimental.pallas import tpu as pltpu

_LANES = 128
_SUBLANES = 8
_DEFAULT_BLOCK_ROWS = 2048  # 2048x128 f32 = 1 MiB per input per pipeline buffer


def _round_up(a, b):
    return ((a + b - 1) // b) * b


def _mixed_loss_partial_kernel(x_ref, t_ref, out_ref, *, gamma, n_elems,
                               binary_targets):
    """One grid step: reduce a (BR, 128) tile to (4, 8, 128) partial sums.

    out_ref block (1, 4, 8, 128):
      row 0: focal elementwise loss   row 1: sigmoid(x)*t
      row 2: sigmoid(x)               row 3: t
    """
    i = pl.program_id(0)
    br = x_ref.shape[0]

    x = x_ref[...].astype(jnp.float32)
    t = t_ref[...].astype(jnp.float32)

    # Validity mask for the ragged tail / Pallas-padded edge block, computed
    # in-kernel (no mask stream from HBM).
    row = jax.lax.broadcasted_iota(jnp.int32, (br, _LANES), 0)
    lane = jax.lax.broadcasted_iota(jnp.int32, (br, _LANES), 1)
    gidx = (i * br + row) * _LANES + lane
    valid = gidx < n_elems
    x = jnp.where(valid, x, 0.0)
    t = jnp.where(valid, t, 0.0)

    # Stable softplus(-x); reused for both the BCE term and sigmoid(x).
    max_val = jnp.maximum(-x, 0.0)
    sp = max_val + jnp.log(jnp.exp(-max_val) + jnp.exp(-x - max_val))
    bce = x - x * t + sp

    if binary_targets:
        # logsigmoid(-x*(2t-1)) == -(softplus(-x) + t*x) exactly for t in {0,1}.
        invprobs = -(sp + t * x)
    else:
        z = -x * (t * 2.0 - 1.0)
        mz = jnp.maximum(-z, 0.0)
        invprobs = -(mz + jnp.log(jnp.exp(-mz) + jnp.exp(-z - mz)))

    focal = jnp.exp(invprobs * gamma) * bce
    sig = jnp.exp(-sp)  # sigmoid(x)

    focal = jnp.where(valid, focal, 0.0)
    sig = jnp.where(valid, sig, 0.0)
    # t is already zeroed where invalid, so t and sig*t need no extra masking.

    def rowsum(v):  # (BR,128) -> (8,128) via full-vreg VPU adds (no XLU in loop)
        return jnp.sum(v.reshape(-1, _SUBLANES, _LANES), axis=0)

    out_ref[0, 0, :, :] = rowsum(focal)
    out_ref[0, 1, :, :] = rowsum(sig * t)
    out_ref[0, 2, :, :] = rowsum(sig)
    out_ref[0, 3, :, :] = rowsum(t)


def mixed_loss(x, t, *, alpha=10.0, gamma=2.0,
               block_rows=_DEFAULT_BLOCK_ROWS, assume_binary_targets=False):
    """Pallas implementation of MixedLoss(alpha, gamma).forward(x, t)."""
    assert x.shape == t.shape, "Target size must match input size"
    n = int(x.size)

    xf = x.reshape(-1)
    tf = t.reshape(-1)
    rem = (-n) % _LANES
    if rem:  # tiny pad only when n is not a multiple of 128
        xf = jnp.pad(xf, (0, rem))
        tf = jnp.pad(tf, (0, rem))
    rows = (n + rem) // _LANES
    x2 = xf.reshape(rows, _LANES)
    t2 = tf.reshape(rows, _LANES)

    br = min(_round_up(block_rows, _SUBLANES), _round_up(rows, _SUBLANES))
    num_blocks = -(-rows // br)

    kernel = partial(_mixed_loss_partial_kernel,
                     gamma=float(gamma), n_elems=n,
                     binary_targets=bool(assume_binary_targets))

    partials = pl.pallas_call(
        kernel,
        out_shape=jax.ShapeDtypeStruct((num_blocks, 4, _SUBLANES, _LANES),
                                       jnp.float32),
        grid_spec=pltpu.PrefetchScalarGridSpec(
            num_scalar_prefetch=0,
            grid=(num_blocks,),
            in_specs=[
                pl.BlockSpec((br, _LANES), lambda i: (i, 0)),
                pl.BlockSpec((br, _LANES), lambda i: (i, 0)),
            ],
            out_specs=pl.BlockSpec((1, 4, _SUBLANES, _LANES),
                                   lambda i: (i, 0, 0, 0)),
        ),
        compiler_params=pltpu.CompilerParams(
            dimension_semantics=("parallel",)),
    )(x2, t2)

    # Tiny final reduction + dice/log combine on (num_blocks, 4, 8, 128).
    sums = jnp.sum(partials, axis=(0, 2, 3))  # (4,)
    focal_mean = sums[0] / jnp.float32(n)
    dice = (2.0 * sums[1] + 1.0) / (sums[2] + sums[3] + 1.0)
    return alpha * focal_mean - jnp.log(dice)


def _mixed_loss_ref(x, t, alpha, gamma):
    """Pure-JAX reference mirroring the PyTorch module."""
    x = x.astype(jnp.float32)
    t = t.astype(jnp.float32)
    max_val = jnp.maximum(-x, 0.0)
    bce = x - x * t + max_val + jnp.log(jnp.exp(-max_val) + jnp.exp(-x - max_val))
    invprobs = jax.nn.log_sigmoid(-x * (t * 2.0 - 1.0))
    focal = jnp.mean(jnp.exp(invprobs * gamma) * bce)
    sig = jax.nn.sigmoid(x)
    inter = jnp.sum(sig * t)
    dice = (2.0 * inter + 1.0) / (jnp.sum(sig) + jnp.sum(t) + 1.0)
    return alpha * focal - jnp.log(dice)


if __name__ == "__main__":
    # MixedLoss(alpha, gamma) hyper-parameters (deterministic, no learned weights).
    alpha, gamma = 10.0, 2.0

    key = jax.random.PRNGKey(0)
    k1, k2 = jax.random.split(key)
    # Segmentation-style inputs: logits and binary mask, NCHW (2, 4, 16, 16).
    x = jax.random.normal(k1, (2, 4, 16, 16), dtype=jnp.float32)
    t = (jax.random.uniform(k2, (2, 4, 16, 16)) > 0.5).astype(jnp.float32)

    ref = jax.block_until_ready(_mixed_loss_ref(x, t, alpha, gamma))

    # Exact (general-target) path.
    loss = jax.block_until_ready(mixed_loss(x, t, alpha=alpha, gamma=gamma))
    assert jnp.allclose(loss, ref, rtol=1e-5, atol=1e-5), (loss, ref)

    # Binary-target fast path (fewer transcendentals; exact for t in {0,1}).
    loss_b = jax.block_until_ready(
        mixed_loss(x, t, alpha=alpha, gamma=gamma, assume_binary_targets=True))
    assert jnp.allclose(loss_b, ref, rtol=1e-4, atol=1e-4), (loss_b, ref)

    print("KERNEL_OK")
</pallas_src>

<mosaic_0001>
module attributes {stable_mosaic.version = 11 : i64} {
  func.func @_mixed_loss_partial_kernel(%arg0: i32, %arg1: memref<16x128xf32, #tpu.memory_space<vmem>>, %arg2: memref<16x128xf32, #tpu.memory_space<vmem>>, %arg3: memref<1x4x8x128xf32, #tpu.memory_space<vmem>>) attributes {dimension_semantics = [#tpu.dimension_semantics<parallel>], iteration_bounds = array<i64: 1>, scalar_prefetch = 0 : i64, scratch_operands = 0 : i64, tpu.core_type = #tpu.core_type<tc>, window_params = [{transform_indices = @transform_0, window_bounds = array<i64: 16, 128>}, {transform_indices = @transform_1, window_bounds = array<i64: 16, 128>}, {transform_indices = @transform_2, window_bounds = array<i64: 1, 4, 8, 128>}]} {
    %c0 = arith.constant 0 : index
    %c0_0 = arith.constant 0 : index
    %0 = vector.load %arg1[%c0, %c0_0] : memref<16x128xf32, #tpu.memory_space<vmem>>, vector<16x128xf32>
    %c0_1 = arith.constant 0 : index
    %c0_2 = arith.constant 0 : index
    %1 = vector.load %arg2[%c0_1, %c0_2] : memref<16x128xf32, #tpu.memory_space<vmem>>, vector<16x128xf32>
    %2 = tpu.iota {dimensions = array<i32: 0>} : vector<16x128xi32>
    %3 = tpu.iota {dimensions = array<i32: 1>} : vector<16x128xi32>
    %c16_i32 = arith.constant 16 : i32
    %4 = arith.muli %arg0, %c16_i32 : i32
    %5 = vector.broadcast %4 : i32 to vector<16x128xi32>
    %6 = arith.addi %5, %2 : vector<16x128xi32>
    %c128_i32 = arith.constant 128 : i32
    %7 = vector.broadcast %c128_i32 : i32 to vector<16x128xi32>
    %8 = arith.muli %6, %7 : vector<16x128xi32>
    %9 = arith.addi %8, %3 : vector<16x128xi32>
    %c2048_i32 = arith.constant 2048 : i32
    %10 = vector.broadcast %c2048_i32 : i32 to vector<16x128xi32>
    %11 = arith.cmpi slt, %9, %10 : vector<16x128xi32>
    %cst = arith.constant 0.000000e+00 : f32
    %12 = vector.broadcast %cst : f32 to vector<16x128xf32>
    %13 = arith.select %11, %0, %12 : vector<16x128xi1>, vector<16x128xf32>
    %cst_3 = arith.constant 0.000000e+00 : f32
    %14 = vector.broadcast %cst_3 : f32 to vector<16x128xf32>
    %15 = arith.select %11, %1, %14 : vector<16x128xi1>, vector<16x128xf32>
    %cst_4 = arith.constant 0.000000e+00 : f32
    %16 = vector.broadcast %cst_4 : f32 to vector<16x128xf32>
    %17 = arith.subf %16, %13 : vector<16x128xf32>
    %cst_5 = arith.constant 0.000000e+00 : f32
    %18 = vector.broadcast %cst_5 : f32 to vector<16x128xf32>
    %19 = arith.maximumf %17, %18 : vector<16x128xf32>
    %cst_6 = arith.constant 0.000000e+00 : f32
    %20 = vector.broadcast %cst_6 : f32 to vector<16x128xf32>
    %21 = arith.subf %20, %19 : vector<16x128xf32>
    %22 = math.exp %21 : vector<16x128xf32>
    %cst_7 = arith.constant 0.000000e+00 : f32
    %23 = vector.broadcast %cst_7 : f32 to vector<16x128xf32>
    %24 = arith.subf %23, %13 : vector<16x128xf32>
    %25 = arith.subf %24, %19 : vector<16x128xf32>
    %26 = math.exp %25 : vector<16x128xf32>
    %27 = arith.addf %22, %26 : vector<16x128xf32>
    %28 = math.log %27 : vector<16x128xf32>
    %29 = arith.addf %19, %28 : vector<16x128xf32>
    %30 = arith.mulf %13, %15 : vector<16x128xf32>
    %31 = arith.subf %13, %30 : vector<16x128xf32>
    %32 = arith.addf %31, %29 : vector<16x128xf32>
    %cst_8 = arith.constant 0.000000e+00 : f32
    %33 = vector.broadcast %cst_8 : f32 to vector<16x128xf32>
    %34 = arith.subf %33, %13 : vector<16x128xf32>
    %cst_9 = arith.constant 2.000000e+00 : f32
    %35 = vector.broadcast %cst_9 : f32 to vector<16x128xf32>
    %36 = arith.mulf %15, %35 : vector<16x128xf32>
    %cst_10 = arith.constant 1.000000e+00 : f32
    %37 = vector.broadcast %cst_10 : f32 to vector<16x128xf32>
    %38 = arith.subf %36, %37 : vector<16x128xf32>
    %39 = arith.mulf %34, %38 : vector<16x128xf32>
    %cst_11 = arith.constant 0.000000e+00 : f32
    %40 = vector.broadcast %cst_11 : f32 to vector<16x128xf32>
    %41 = arith.subf %40, %39 : vector<16x128xf32>
    %cst_12 = arith.constant 0.000000e+00 : f32
    %42 = vector.broadcast %cst_12 : f32 to vector<16x128xf32>
    %43 = arith.maximumf %41, %42 : vector<16x128xf32>
    %cst_13 = arith.constant 0.000000e+00 : f32
    %44 = vector.broadcast %cst_13 : f32 to vector<16x128xf32>
    %45 = arith.subf %44, %43 : vector<16x128xf32>
    %46 = math.exp %45 : vector<16x128xf32>
    %cst_14 = arith.constant 0.000000e+00 : f32
    %47 = vector.broadcast %cst_14 : f32 to vector<16x128xf32>
    %48 = arith.subf %47, %39 : vector<16x128xf32>
    %49 = arith.subf %48, %43 : vector<16x128xf32>
    %50 = math.exp %49 : vector<16x128xf32>
    %51 = arith.addf %46, %50 : vector<16x128xf32>
    %52 = math.log %51 : vector<16x128xf32>
    %53 = arith.addf %43, %52 : vector<16x128xf32>
    %cst_15 = arith.constant 0.000000e+00 : f32
    %54 = vector.broadcast %cst_15 : f32 to vector<16x128xf32>
    %55 = arith.subf %54, %53 : vector<16x128xf32>
    %cst_16 = arith.constant 2.000000e+00 : f32
    %56 = vector.broadcast %cst_16 : f32 to vector<16x128xf32>
    %57 = arith.mulf %55, %56 : vector<16x128xf32>
    %58 = math.exp %57 : vector<16x128xf32>
    %59 = arith.mulf %58, %32 : vector<16x128xf32>
    %cst_17 = arith.constant 0.000000e+00 : f32
    %60 = vector.broadcast %cst_17 : f32 to vector<16x128xf32>
    %61 = arith.subf %60, %29 : vector<16x128xf32>
    %62 = math.exp %61 : vector<16x128xf32>
    %cst_18 = arith.constant 0.000000e+00 : f32
    %63 = vector.broadcast %cst_18 : f32 to vector<16x128xf32>
    %64 = arith.select %11, %59, %63 : vector<16x128xi1>, vector<16x128xf32>
    %cst_19 = arith.constant 0.000000e+00 : f32
    %65 = vector.broadcast %cst_19 : f32 to vector<16x128xf32>
    %66 = arith.select %11, %62, %65 : vector<16x128xi1>, vector<16x128xf32>
    %67 = vector.shape_cast %64 : vector<16x128xf32> to vector<2x8x128xf32>
    %cst_20 = arith.constant dense<0.000000e+00> : vector<8x128xf32>
    %68 = vector.multi_reduction <add>, %67, %cst_20 [0] : vector<2x8x128xf32> to vector<8x128xf32>
    %c0_21 = arith.constant 0 : index
    %c0_22 = arith.constant 0 : index
    %c0_23 = arith.constant 0 : index
    %c0_24 = arith.constant 0 : index
    %69 = vector.load %arg3[%c0_21, %c0_22, %c0_23, %c0_24] : memref<1x4x8x128xf32, #tpu.memory_space<vmem>>, vector<1x1x8x128xf32>
    %70 = vector.shape_cast %69 : vector<1x1x8x128xf32> to vector<8x128xf32>
    %71 = vector.shape_cast %68 : vector<8x128xf32> to vector<1x1x8x128xf32>
    tpu.vector_store %arg3[%c0_21, %c0_22, %c0_23, %c0_24], %71 {strides = array<i32>} : memref<1x4x8x128xf32, #tpu.memory_space<vmem>>, vector<1x1x8x128xf32>,
    %72 = arith.mulf %66, %15 : vector<16x128xf32>
    %73 = vector.shape_cast %72 : vector<16x128xf32> to vector<2x8x128xf32>
    %cst_25 = arith.constant dense<0.000000e+00> : vector<8x128xf32>
    %74 = vector.multi_reduction <add>, %73, %cst_25 [0] : vector<2x8x128xf32> to vector<8x128xf32>
    %c0_26 = arith.constant 0 : index
    %c1 = arith.constant 1 : index
    %c0_27 = arith.constant 0 : index
    %c0_28 = arith.constant 0 : index
    %75 = vector.load %arg3[%c0_26, %c1, %c0_27, %c0_28] : memref<1x4x8x128xf32, #tpu.memory_space<vmem>>, vector<1x1x8x128xf32>
    %76 = vector.shape_cast %75 : vector<1x1x8x128xf32> to vector<8x128xf32>
    %77 = vector.shape_cast %74 : vector<8x128xf32> to vector<1x1x8x128xf32>
    tpu.vector_store %arg3[%c0_26, %c1, %c0_27, %c0_28], %77 {strides = array<i32>} : memref<1x4x8x128xf32, #tpu.memory_space<vmem>>, vector<1x1x8x128xf32>,
    %78 = vector.shape_cast %66 : vector<16x128xf32> to vector<2x8x128xf32>
    %cst_29 = arith.constant dense<0.000000e+00> : vector<8x128xf32>
    %79 = vector.multi_reduction <add>, %78, %cst_29 [0] : vector<2x8x128xf32> to vector<8x128xf32>
    %c0_30 = arith.constant 0 : index
    %c2 = arith.constant 2 : index
    %c0_31 = arith.constant 0 : index
    %c0_32 = arith.constant 0 : index
    %80 = vector.load %arg3[%c0_30, %c2, %c0_31, %c0_32] : memref<1x4x8x128xf32, #tpu.memory_space<vmem>>, vector<1x1x8x128xf32>
    %81 = vector.shape_cast %80 : vector<1x1x8x128xf32> to vector<8x128xf32>
    %82 = vector.shape_cast %79 : vector<8x128xf32> to vector<1x1x8x128xf32>
    tpu.vector_store %arg3[%c0_30, %c2, %c0_31, %c0_32], %82 {strides = array<i32>} : memref<1x4x8x128xf32, #tpu.memory_space<vmem>>, vector<1x1x8x128xf32>,
    %83 = vector.shape_cast %15 : vector<16x128xf32> to vector<2x8x128xf32>
    %cst_33 = arith.constant dense<0.000000e+00> : vector<8x128xf32>
    %84 = vector.multi_reduction <add>, %83, %cst_33 [0] : vector<2x8x128xf32> to vector<8x128xf32>
    %c0_34 = arith.constant 0 : index
    %c3 = arith.constant 3 : index
    %c0_35 = arith.constant 0 : index
    %c0_36 = arith.constant 0 : index
    %85 = vector.load %arg3[%c0_34, %c3, %c0_35, %c0_36] : memref<1x4x8x128xf32, #tpu.memory_space<vmem>>, vector<1x1x8x128xf32>
    %86 = vector.shape_cast %85 : vector<1x1x8x128xf32> to vector<8x128xf32>
    %87 = vector.shape_cast %84 : vector<8x128xf32> to vector<1x1x8x128xf32>
    tpu.vector_store %arg3[%c0_34, %c3, %c0_35, %c0_36], %87 {strides = array<i32>} : memref<1x4x8x128xf32, #tpu.memory_space<vmem>>, vector<1x1x8x128xf32>,
    return
  }
  func.func @transform_0(%arg0: i32) -> (i32, i32) {
    %c0_i32 = arith.constant 0 : i32
    %c0_i32_0 = arith.constant 0 : i32
    return %arg0, %c0_i32 : i32, i32
  }
  func.func @transform_1(%arg0: i32) -> (i32, i32) {
    %c0_i32 = arith.constant 0 : i32
    %c0_i32_0 = arith.constant 0 : i32
    return %arg0, %c0_i32 : i32, i32
  }
  func.func @transform_2(%arg0: i32) -> (i32, i32, i32, i32) {
    %c0_i32 = arith.constant 0 : i32
    %c0_i32_0 = arith.constant 0 : i32
    %c0_i32_1 = arith.constant 0 : i32
    %c0_i32_2 = arith.constant 0 : i32
    return %arg0, %c0_i32, %c0_i32_0, %c0_i32_1 : i32, i32, i32, i32
  }
}

</mosaic_0001>

<bundles_post_ra>
// kernel: tpu_custom_call.1
= control target key start
LH: loop header
LB: loop body
LE: loop exit
PB: predicated region body
PF: predicated region fallthrough
CT: control target
= control target key end

     0   :  { %7 = vsyncpa [#allocation3], 0  ;;  %s379_s0 = inlined_call_operand.hbm [shape: f32[16,128], index: 0, kind: input, shape index: {}]   ;;  %s380_s1 = inlined_call_operand.hbm [shape: f32[16,128], index: 1, kind: input, shape index: {}]   ;;  %s381_s2 = inlined_call_operand.hbm [shape: f32[1,4,8,128], index: 2, kind: output, shape index: {}]  }
   0x1   :  { %8 = vsyncpa [#allocation6], 0 }
   0x2   :  { %9 = vsyncpa [#allocation4], 0  ;;  %s14_s11 = sshll.u32 %s379_s0, 4  ;;  %s297_s12 = smov [#allocation2]   ;;  %s15_s11 = int_to_ptr.hbm [resolvable:$true] %s14_s11 }
   0x3   :  { %s16_s13 = sshll.u32 %s297_s12, 4  ;;  %s27_s16 = sshll.u32 %s380_s1, 4  ;;  %s17_s13 = int_to_ptr.vmem [resolvable:$true] %s16_s13  ;;  %s28_s16 = int_to_ptr.hbm [resolvable:$true] %s27_s16 }
   0x4   :  { %s298_s17 = smov 128   ;;  %s299_s18 = smov 8  }
   0x5   :  { %22 = dma.hbm_to_vmem [thread:$0]  %s15_s11, 256, %s17_s13, [#allocation3], %s298_s17, %s298_s17, %s299_s18  }
   0x6   :  { %s300_s19 = smov [#allocation5]  }
   0x7   :  { %s29_s20 = sshll.u32 %s300_s19, 4  ;;  %s30_s20 = int_to_ptr.vmem [resolvable:$true] %s29_s20 }
   0x8   :  { %35 = dma.hbm_to_vmem [thread:$0]  %s28_s16, 256, %s30_s20, [#allocation6], %s298_s17, %s298_s17, %s299_s18  }
   0x9   :  { %291 = dma.done.wait [#allocation3], 256  }
   0xa   :  { %292 = vsyncadd [#allocation3], 4294967040 }
   0xb   :  { %293 = dma.done.wait [#allocation6], 256  }
   0xc   :  { %294 = vsyncadd [#allocation6], 4294967040  ;;  %v48_v0 = vlaneseq  ;;  %v44_v7 = vld [vmem:[#allocation2] sm:$0xff]  ;;  %v46_v8 = vld [vmem:[#allocation5] sm:$0xff]  ;;  %s301_s0 = smov [#allocation7]   ;;  %s166_s23 = sshll.u32 %s381_s2, 4  ;;  %s167_s23 = int_to_ptr.hbm [resolvable:$true] %s166_s23 }
   0xd   :  { %v45_v9 = vld [vmem:[#allocation2 + $0x8] sm:$0xff]  ;;  %v47_v10 = vld [vmem:[#allocation5 + $0x8] sm:$0xff]  ;;  %s164_s1 = sshll.u32 %s301_s0, 4  ;;  %s165_s1 = int_to_ptr.vmem [resolvable:$true] %s164_s1 }
   0xe   :  { %v49_v1 = vshrl.u32 %v48_v0, 7  ;;  %v52_v2 = vand.u32 127, %v48_v0 }
  0x10   :  { %v50_v3 = vadd.s32 8, %v49_v1  ;;  %v57_v4 = vmul.u32 128, %v49_v1 }
  0x12   :  { %v58_v5 = vmul.u32 128, %v50_v3  ;;  %v329_v6 = vadd.s32 %v57_v4, %v52_v2 }
  0x14   :  { %v331_v11 = vadd.s32 %v58_v5, %v52_v2  ;;  %vm61_vm0 = vcmp.lt.s32.totalorder %v329_v6, 2048 }
  0x15   :  { %v336_v12 = vsel %vm61_vm0, %v44_v7, 0.0  ;;  %v340_v13 = vsel %vm61_vm0, %v46_v8, 0.0 }
  0x16   :  { %vm62_vm1 = vcmp.lt.s32.totalorder %v331_v11, 2048  ;;  %v67_v14 = vsub.f32 0.0, %v336_v12  ;;  %v97_v15 = vmul.f32 2.0, %v340_v13 }
  0x17   :  { %v347_v16 = vsel %vm62_vm1, %v45_v9, 0.0  ;;  %v351_v17 = vsel %vm62_vm1, %v47_v10, 0.0 }
  0x18   :  { %v68_v18 = vsub.f32 0.0, %v347_v16  ;;  %v69_v19 = vmax.f32 %v67_v14, 0.0  ;;  %v98_v20 = vmul.f32 2.0, %v351_v17  ;;  %v180_v21 = vadd.f32 -1.0, %v97_v15 }
  0x19   :  { %v157_v56 = vadd.f32 %v351_v17, %v340_v13  ;;  %v91_v15 = vmul.f32 %v340_v13, %v336_v12 }
  0x1a   :  { %v70_v22 = vmax.f32 %v68_v18, 0.0  ;;  %v71_v23 = vsub.f32 0.0, %v69_v19  ;;  %v77_v24 = vsub.f32 %v67_v14, %v69_v19  ;;  %v181_v25 = vadd.f32 -1.0, %v98_v20 }
  0x1b   :  { %v101_v26 = vmul.f32 %v180_v21, %v67_v14  ;;  %159 = vst [vmem:[#allocation7 + $0x18] sm:$0xff] %v157_v56 }
  0x1c   :  { %v72_v27 = vsub.f32 0.0, %v70_v22  ;;  %v73_v28 = vmul.f32 1.442695, %v71_v23  ;;  %v78_v29 = vsub.f32 %v68_v18, %v70_v22  ;;  %v79_v30 = vmul.f32 1.442695, %v77_v24 }
  0x1d   :  { %v102_v31 = vmul.f32 %v181_v25, %v68_v18  ;;  %v103_v32 = vsub.f32 0.0, %v101_v26  ;;  %v93_v26 = vsub.f32 %v336_v12, %v91_v15 }
  0x1e   :  { %187 = vpow2.f32 %v73_v28  ;;  %v75_v33 = vmul.f32 1.442695, %v72_v27  ;;  %v81_v34 = vmul.f32 1.442695, %v78_v29 }
  0x1f   :  { %189 = vpow2.f32 %v79_v30  ;;  %v104_v35 = vsub.f32 0.0, %v102_v31  ;;  %v105_v36 = vmax.f32 %v103_v32, 0.0 }
  0x20   :  { %191 = vpow2.f32 %v75_v33 }
  0x21   :  { %193 = vpow2.f32 %v81_v34  ;;  %v106_v37 = vmax.f32 %v104_v35, 0.0  ;;  %v107_v38 = vsub.f32 0.0, %v105_v36  ;;  %v113_v39 = vsub.f32 %v103_v32, %v105_v36 }
  0x23   :  { %v108_v40 = vsub.f32 0.0, %v106_v37  ;;  %v109_v41 = vmul.f32 1.442695, %v107_v38  ;;  %v114_v42 = vsub.f32 %v104_v35, %v106_v37  ;;  %v115_v43 = vmul.f32 1.442695, %v113_v39 }
  0x24   :  { %v188_v44 = vpop.eup %187 }
  0x25   :  { %v190_v45 = vpop.eup %189  ;;  %195 = vpow2.f32 %v109_v41  ;;  %v111_v46 = vmul.f32 1.442695, %v108_v40  ;;  %v117_v47 = vmul.f32 1.442695, %v114_v42 }
  0x26   :  { %v192_v48 = vpop.eup %191  ;;  %v83_v49 = vadd.f32 %v190_v45, %v188_v44  ;;  %197 = vpow2.f32 %v115_v43 }
  0x27   :  { %v194_v50 = vpop.eup %193  ;;  %199 = vpow2.f32 %v111_v46 }
  0x28   :  { %v84_v51 = vadd.f32 %v194_v50, %v192_v48  ;;  %201 = vlog2.f32 %v83_v49 }
  0x29   :  { %203 = vpow2.f32 %v117_v47 }
  0x2a   :  { %205 = vlog2.f32 %v84_v51 }
  0x2b   :  { %v196_v52 = vpop.eup %195 }
  0x2c   :  { %v198_v53 = vpop.eup %197 }
  0x2d   :  { %v200_v54 = vpop.eup %199  ;;  %v119_v55 = vadd.f32 %v198_v53, %v196_v52 }
  0x2e   :  { %v202_v57 = vpop.eup %201 }
  0x2f   :  { %v204_v58 = vpop.eup %203  ;;  %v86_v59 = vmul.f32 0.6931472, %v202_v57  ;;  %207 = vlog2.f32 %v119_v55 }
  0x30   :  { %v206_v60 = vpop.eup %205  ;;  %v120_v61 = vadd.f32 %v204_v58, %v200_v54 }
  0x31   :  { %v88_v62 = vmul.f32 0.6931472, %v206_v60  ;;  %v89_v63 = vadd.f32 %v86_v59, %v69_v19 }
  0x32   :  { %209 = vlog2.f32 %v120_v61 }
  0x33   :  { %v90_v0 = vadd.f32 %v88_v62, %v70_v22  ;;  %v137_v1 = vsub.f32 0.0, %v89_v63  ;;  %v92_v22 = vmul.f32 %v351_v17, %v347_v16  ;;  %v95_v34 = vadd.f32 %v93_v26, %v89_v63 }
  0x35   :  { %v208_v2 = vpop.eup %207  ;;  %v138_v3 = vsub.f32 0.0, %v90_v0  ;;  %v139_v4 = vmul.f32 1.442695, %v137_v1  ;;  %v94_v33 = vsub.f32 %v347_v16, %v92_v22 }
  0x36   :  { %v122_v5 = vmul.f32 0.6931472, %v208_v2 }
  0x37   :  { %v141_v7 = vmul.f32 1.442695, %v138_v3  ;;  %211 = vpow2.f32 %v139_v4  ;;  %v96_v12 = vadd.f32 %v94_v33, %v90_v0 }
  0x38   :  { %v210_v8 = vpop.eup %209  ;;  %v125_v9 = vadd.f32 %v122_v5, %v105_v36 }
  0x39   :  { %v124_v10 = vmul.f32 0.6931472, %v210_v8  ;;  %213 = vpow2.f32 %v141_v7 }
  0x3a   :  { %v127_v14 = vsub.f32 0.0, %v125_v9 }
  0x3b   :  { %v126_v18 = vadd.f32 %v124_v10, %v106_v37 }
  0x3c   :  { %v129_v20 = vmul.f32 2.0, %v127_v14 }
  0x3d   :  { %v212_v19 = vpop.eup %211  ;;  %v128_v21 = vsub.f32 0.0, %v126_v18 }
  0x3e   :  { %v131_v23 = vmul.f32 1.442695, %v129_v20  ;;  %v145_v24 = vsel %vm61_vm0, %v212_v19, 0.0 }
  0x3f   :  { %v214_v25 = vpop.eup %213  ;;  %v130_v27 = vmul.f32 2.0, %v128_v21  ;;  %v149_v28 = vmul.f32 %v145_v24, %v340_v13 }
  0x40   :  { %215 = vpow2.f32 %v131_v23  ;;  %v146_v29 = vsel %vm62_vm1, %v214_v25, 0.0 }
  0x41   :  { %v133_v30 = vmul.f32 1.442695, %v130_v27  ;;  %v150_v31 = vmul.f32 %v146_v29, %v351_v17  ;;  %v154_v32 = vadd.f32 %v146_v29, %v145_v24 }
  0x43   :  { %217 = vpow2.f32 %v133_v30  ;;  %v151_v35 = vadd.f32 %v150_v31, %v149_v28  ;;  %156 = vst [vmem:[#allocation7 + $0x10] sm:$0xff] %v154_v32 }
  0x45   :  { %153 = vst [vmem:[#allocation7 + $0x8] sm:$0xff] %v151_v35 }
  0x46   :  { %v216_v36 = vpop.eup %215 }
  0x47   :  { %v135_v37 = vmul.f32 %v216_v36, %v95_v34 }
  0x49   :  { %v218_v38 = vpop.eup %217  ;;  %v143_v39 = vsel %vm61_vm0, %v135_v37, 0.0 }
  0x4a   :  { %v136_v13 = vmul.f32 %v218_v38, %v96_v12 }
  0x4c   :  { %v144_v16 = vsel %vm62_vm1, %v136_v13, 0.0 }
  0x4d   :  { %v147_v17 = vadd.f32 %v144_v16, %v143_v39 }
  0x4f   :  { %148 = vst [vmem:[#allocation7] sm:$0xff] %v147_v17 }
  0x50   :  { %172 = dma.vmem_to_hbm [thread:$0]  %s165_s1, 512, %s167_s23, [#allocation4], %s298_s17, %s298_s17, %s299_s18  }
  0x51   :  { %295 = dma.done.wait [#allocation4], 512  }
  0x52   :  { %296 = vsyncadd [#allocation4], 4294966784 }
  0x53   :  { %177 = vsyncpa [#allocation3], 1 }
  0x54   :  { %178 = vsyncpa [#allocation6], 1 }
  0x55   :  { %179 = vsyncpa [#allocation4], 1 }

</bundles_post_ra>
